<compile_context>
chip_gen: v6e
topology: v6e:2x2x1
jax: 0.10.0
libtpu: 0.0.40
codegen_flags: <defaults>
</compile_context>

<pallas_src>
import functools

import jax
import jax.numpy as jnp
from jax.experimental import pallas as pl
from jax.experimental.pallas import tpu as pltpu

K = 1.0            # manifold curvature parameter
SQRT_K = 1.0
BN_EPS = 1e-5      # batch-norm eps (self.eps)
CENTROID_EPS = 1e-8
NORM_EPS = 1e-8
F32 = jnp.float32
VMEM_LIMIT = 32 * 1024 * 1024

SUMS_TILE_CAP = 16384   # rows per block, streaming per-batch sum kernel
VAR_TILE_CAP = 8192     # rows per block, Fréchet-variance kernel
APPLY_TILE_CAP = 4096   # rows per block, normalize/apply kernel (has an output block too)


# --------------------------------------------------------------------------------
# Shared scalar helper
# --------------------------------------------------------------------------------
def _acosh(t):
    t = jnp.maximum(t, 1.0)
    return jnp.log(t + jnp.sqrt(jnp.maximum(t * t - 1.0, 1e-15)))


# --------------------------------------------------------------------------------
# Column-layout Lorentz helpers (used inside the kernels).
# Arrays are (D, n): D (time component at row 0) on sublanes, the point axis on lanes.
# --------------------------------------------------------------------------------
def _col_inner(u, v):
    """Lorentz inner product along D (sublanes): sum(u*v) - 2*u0*v0."""
    return jnp.sum(u * v, axis=0, keepdims=True) - 2.0 * u[0:1, :] * v[0:1, :]


def _col_logmap(mu, y):
    """log_mu(y); mu is a (D, 1) point, y is (D, n)."""
    xy = _col_inner(mu, y)                                    # (1, n)
    dist = SQRT_K * _acosh(-xy * (1.0 / K))                   # (1, n)
    nomin = y + (1.0 / K) * xy * mu                           # (D, n)
    inv_den = jax.lax.rsqrt(jnp.maximum(_col_inner(nomin, nomin), NORM_EPS))
    return (dist * inv_den) * nomin


def _col_transp0back(mu_tv, v):
    """Transport v from mu to the origin: v + v0 * mu_tv,
    mu_tv = -sqrt(K)*(mu + o)/(K + sqrt(K)*mu0) (precomputed in the wrapper)."""
    return v + v[0:1, :] * mu_tv


def _col_transp0(bta, bta_tv, u):
    """Transport u from the origin to beta: u + <beta,u>_L * bta_tv,
    bta_tv = (beta + o)/(K + sqrt(K)*beta0) (precomputed in the wrapper)."""
    return u + _col_inner(bta, u) * bta_tv


def _col_expmap(bta, u):
    """exp_beta(u); bta is (D, 1), u is (D, n)."""
    sq = jnp.maximum(_col_inner(u, u), NORM_EPS)              # (1, n)
    inv_n = jax.lax.rsqrt(sq)                                 # 1 / ||u||_L
    n = sq * inv_n                                            # ||u||_L
    e = jnp.exp(n * (1.0 / SQRT_K))
    ei = jnp.exp(-n * (1.0 / SQRT_K))
    cosh = 0.5 * (e + ei)
    sinh = 0.5 * (e - ei)
    return cosh * bta + (SQRT_K * sinh * inv_n) * u


# --------------------------------------------------------------------------------
# Row-layout helpers (plain JAX — wrapper glue on (B, D)/(D,)-sized data + reference).
# --------------------------------------------------------------------------------
def _row_origin(d):
    idx = jax.lax.iota(jnp.int32, d)
    return jnp.where(idx == 0, SQRT_K, 0.0).astype(F32)


def _row_inner(u, v):
    return jnp.sum(u * v, axis=-1, keepdims=True) - 2.0 * u[..., 0:1] * v[..., 0:1]


def _row_centroid_project(avg):
    inner = jnp.maximum(jnp.abs(_row_inner(avg, avg)), CENTROID_EPS)
    return (SQRT_K * jax.lax.rsqrt(inner)) * avg


def _row_logmap(x, y):
    xy = _row_inner(x, y)
    dist = SQRT_K * _acosh(-xy / K)
    nomin = y + (1.0 / K) * xy * x
    inv_den = jax.lax.rsqrt(jnp.maximum(_row_inner(nomin, nomin), NORM_EPS))
    return (dist * inv_den) * nomin


def _row_transp0back(mu, v):
    o = _row_origin(mu.shape[-1])
    coeff = (-SQRT_K * v[..., 0:1]) / (K + SQRT_K * mu[..., 0:1])
    return v + coeff * (mu + o)


def _row_transp0(bta, u):
    o = _row_origin(bta.shape[-1])
    inner = _row_inner(bta, u)
    return u + inner / (K + SQRT_K * bta[..., 0:1]) * (o + bta)


def _row_expmap(x, u):
    sq = jnp.maximum(_row_inner(u, u), NORM_EPS)
    inv_n = jax.lax.rsqrt(sq)
    n = sq * inv_n
    e = jnp.exp(n / SQRT_K)
    ei = jnp.exp(-n / SQRT_K)
    return 0.5 * (e + ei) * x + (SQRT_K * 0.5 * (e - ei) * inv_n) * u


# --------------------------------------------------------------------------------
# Tiling helper
# --------------------------------------------------------------------------------
def _pick_tile(n, cap):
    """Largest block row-count <= cap: full n if it fits, else an exact divisor
    (multiple of 128 preferred, then 8), else `cap` with a masked ragged tail."""
    if n <= cap:
        return max(n, 1)
    for t in range(cap, 127, -128):
        if n % t == 0:
            return t
    for t in range(cap, 7, -8):
        if n % t == 0:
            return t
    return cap


# --------------------------------------------------------------------------------
# Kernels
# --------------------------------------------------------------------------------
def _sums_kernel(x_ref, osum_ref, *, s_total, s_tile, ragged):
    """Per-batch sum over the point axis. Row layout; sublane reduction, no transpose."""
    s = pl.program_id(1)
    xb = x_ref[...].astype(F32)                                # (s_tile, D)
    if ragged:
        valid = s_total - s * s_tile
        row = jax.lax.broadcasted_iota(jnp.int32, xb.shape, 0)
        xb = jnp.where(row < valid, xb, 0.0)

    @pl.when(s == 0)
    def _():
        osum_ref[...] = jnp.zeros_like(osum_ref)

    osum_ref[...] += jnp.sum(xb, axis=0, keepdims=True)        # (1, D)


def _var_kernel(x_ref, p_ref, vsum_ref, *, n_total, n_tile, ragged):
    """Fréchet variance accumulation: sum over points of ||transp0back(mu, log_mu(x))||."""
    i = pl.program_id(0)
    # lane-dense column layout produced in VMEM (no HBM transpose of x)
    y = jnp.transpose(x_ref[...].astype(F32))                  # (D, n_tile)
    mu = p_ref[:, 0:1]                                         # (D, 1)
    mu_tv = p_ref[:, 1:2]                                      # (D, 1)

    u = _col_transp0back(mu_tv, _col_logmap(mu, y))            # (D, n_tile)
    nrm = jnp.sqrt(jnp.sum(u * u, axis=0, keepdims=True))      # (1, n_tile) Euclid. norms
    if ragged:
        valid = n_total - i * n_tile
        lane = jax.lax.broadcasted_iota(jnp.int32, nrm.shape, 1)
        nrm = jnp.where(lane < valid, nrm, 0.0)

    @pl.when(i == 0)
    def _():
        vsum_ref[...] = jnp.zeros_like(vsum_ref)

    vsum_ref[...] += jnp.sum(nrm, axis=1, keepdims=True)       # (1, 1)


def _apply_kernel(x_ref, p_ref, scale_ref, o_ref):
    """logmap at mean, transp0back, scale by gamma/(var+eps), transp0 to beta, expmap."""
    y = jnp.transpose(x_ref[...].astype(F32))                  # (D, n_tile) columns
    mu = p_ref[:, 0:1]
    mu_tv = p_ref[:, 1:2]
    bta = p_ref[:, 2:3]
    bta_tv = p_ref[:, 3:4]

    u = _col_transp0back(mu_tv, _col_logmap(mu, y))
    u = u * scale_ref[0]                                       # gamma/(var+eps) from SMEM
    u = _col_transp0(bta, bta_tv, u)
    out_col = _col_expmap(bta, u)                              # (D, n_tile)
    # write back in the native (N, D) layout (in-VMEM transpose, no HBM transpose pass)
    o_ref[...] = jnp.transpose(out_col).astype(o_ref.dtype)


# --------------------------------------------------------------------------------
# Forward wrapper
# --------------------------------------------------------------------------------
def group_lorentz_batchnorm(x, beta, gamma, running_mean, running_var, momentum=0.1):
    """Training-mode forward of GroupLorentzBatchNorm.

    Returns (output, new_running_mean, new_running_var).
    """
    squeeze = (x.ndim == 2)
    if squeeze:
        x = x[None]                                 # (1, N, D) — 2-D torch path
    B, S, D = x.shape
    N = B * S
    xf = x.reshape(N, D)                            # free view; D stays innermost

    # ---- Kernel 1: per-batch sums over the point axis -----------------------------
    s_tile = _pick_tile(S, SUMS_TILE_CAP)
    ns = pl.cdiv(S, s_tile)
    s_ragged = (S % s_tile) != 0
    bsums = pl.pallas_call(
        functools.partial(_sums_kernel, s_total=S, s_tile=s_tile, ragged=s_ragged),
        out_shape=jax.ShapeDtypeStruct((B, 1, D), F32),
        grid=(B, ns),
        in_specs=[pl.BlockSpec((None, s_tile, D), lambda b, s: (b, s, 0))],
        out_specs=pl.BlockSpec((None, 1, D), lambda b, s: (b, 0, 0)),
        compiler_params=pltpu.CompilerParams(
            dimension_semantics=("parallel", "arbitrary"),
            vmem_limit_bytes=VMEM_LIMIT),
    )(x)

    # tiny (B, D)-sized glue: per-batch centroid projection, then centroid of centroids
    bmeans = bsums[:, 0, :] * (1.0 / S)                            # per-batch mean
    bcent = _row_centroid_project(bmeans)                          # per-batch centroid
    mean_row = _row_centroid_project(jnp.mean(bcent, axis=0))      # (D,) global mean

    origin = _row_origin(D)
    beta_row = beta.astype(F32).reshape(D)
    # precomputed parallel-transport direction vectors (hoisted out of the kernels)
    mu_tv = (-SQRT_K / (K + SQRT_K * mean_row[0])) * (mean_row + origin)
    bta_tv = (beta_row + origin) / (K + SQRT_K * beta_row[0])
    var_params = jnp.stack([mean_row, mu_tv], axis=1)              # (D, 2)
    apply_params = jnp.stack([mean_row, mu_tv, beta_row, bta_tv], axis=1)   # (D, 4)

    # ---- Kernel 2: Fréchet variance over all B*S points ---------------------------
    v_tile = _pick_tile(N, VAR_TILE_CAP)
    nv = pl.cdiv(N, v_tile)
    v_ragged = (N % v_tile) != 0
    vsum = pl.pallas_call(
        functools.partial(_var_kernel, n_total=N, n_tile=v_tile, ragged=v_ragged),
        out_shape=jax.ShapeDtypeStruct((1, 1), F32),
        grid=(nv,),
        in_specs=[pl.BlockSpec((v_tile, D), lambda i: (i, 0)),
                  pl.BlockSpec((D, 2), lambda i: (0, 0))],
        out_specs=pl.BlockSpec((1, 1), lambda i: (0, 0)),
        compiler_params=pltpu.CompilerParams(
            dimension_semantics=("arbitrary",),
            vmem_limit_bytes=VMEM_LIMIT),
    )(xf, var_params)
    var = vsum[0, 0] * (1.0 / N)

    # gamma / (var + eps) computed once; reaches the apply kernel as a single SMEM scalar
    scale = (gamma.astype(F32).reshape(()) / (var + BN_EPS)).reshape(1)

    # ---- Kernel 3: normalize in tangent space, transport to beta, expmap ----------
    a_tile = _pick_tile(N, APPLY_TILE_CAP)
    na = pl.cdiv(N, a_tile)
    out_flat = pl.pallas_call(
        _apply_kernel,
        out_shape=jax.ShapeDtypeStruct((N, D), F32),
        grid=(na,),
        in_specs=[pl.BlockSpec((a_tile, D), lambda i: (i, 0)),
                  pl.BlockSpec((D, 4), lambda i: (0, 0)),
                  pl.BlockSpec(memory_space=pltpu.MemorySpace.SMEM)],
        out_specs=pl.BlockSpec((a_tile, D), lambda i: (i, 0)),
        compiler_params=pltpu.CompilerParams(
            dimension_semantics=("parallel",),
            vmem_limit_bytes=VMEM_LIMIT),
    )(xf, apply_params, scale)
    out = out_flat.reshape(B, S, D)

    # ---- running-stat side effects (D-sized glue, plain JAX) ----------------------
    # TODO(synk): torch mutates the buffers in place; no Pallas equivalent — returned as outputs.
    rm_point = _row_expmap(origin, running_mean.astype(F32))       # expmap0
    means = jnp.stack([rm_point, mean_row], axis=0)                # (2, D)
    w = jnp.array([1.0 - momentum, momentum], dtype=F32)
    weighted_centroid = _row_centroid_project(w @ means)           # (D,)
    new_running_mean = _row_logmap(origin, weighted_centroid)      # logmap0
    new_running_var = (1.0 - momentum) * running_var.astype(F32) + momentum * var.reshape(1)

    if squeeze:
        out = out[0]
    return out, new_running_mean, new_running_var


# --------------------------------------------------------------------------------
# Pure-JAX reference (same math, row layout)
# --------------------------------------------------------------------------------
def reference_forward(x, beta, gamma):
    if x.ndim == 2:
        x = x[None]
    B, S, D = x.shape
    m = jnp.mean(x, axis=1, keepdims=True)                               # (B, 1, D)
    c_b = _row_centroid_project(m)                                       # per-batch centroid
    mean = _row_centroid_project(jnp.mean(c_b, axis=0, keepdims=True))   # (1, 1, D)
    u = _row_logmap(mean, x)
    u = _row_transp0back(mean, u)
    var = jnp.mean(jnp.sqrt(jnp.sum(u * u, axis=-1)))                    # Fréchet variance
    u = u * (gamma.reshape(()) / (var + BN_EPS))
    beta3 = beta.reshape(1, 1, D)
    u = _row_transp0(beta3, u)
    return _row_expmap(beta3, u)


if __name__ == "__main__":
    # Module config: num_features=5, input_stabilizer_size=4
    num_features = 5
    input_stabilizer_size = 4
    D = (num_features - 1) * input_stabilizer_size + 1   # 17 (as in __init__)
    B, S = 2, 8

    # Deterministic input: random tangent directions lifted onto the hyperboloid.
    key = jax.random.PRNGKey(0)
    v = 0.5 * jax.random.normal(key, (B, S, D - 1), dtype=jnp.float32)
    x0 = jnp.sqrt(K + jnp.sum(v * v, axis=-1, keepdims=True))
    x = jnp.concatenate([x0, v], axis=-1)                 # <x,x>_L = -K

    # Parameters / buffers exactly as in __init__ (deterministic).
    beta = _row_origin(D)                                 # ManifoldParameter origin
    gamma = jnp.ones((1,), jnp.float32)
    running_mean = jnp.zeros((D,), jnp.float32)
    running_var = jnp.ones((1,), jnp.float32)

    out, new_rm, new_rv = group_lorentz_batchnorm(
        x, beta, gamma, running_mean, running_var, momentum=0.1)
    out = jax.block_until_ready(out)
    jax.block_until_ready((new_rm, new_rv))

    ref = reference_forward(x, beta, gamma)
    assert bool(jnp.all(jnp.isfinite(out)))
    assert bool(jnp.allclose(out, ref, rtol=1e-4, atol=1e-4)), \
        float(jnp.max(jnp.abs(out - ref)))
    print("KERNEL_OK")
</pallas_src>

<mosaic_0001>
module attributes {stable_mosaic.version = 11 : i64} {
  func.func @_sums_kernel(%arg0: i32, %arg1: i32, %arg2: memref<1x8x17xf32, #tpu.memory_space<vmem>>, %arg3: memref<1x1x17xf32, #tpu.memory_space<vmem>>) attributes {dimension_semantics = [#tpu.dimension_semantics<parallel>, #tpu.dimension_semantics<arbitrary>], iteration_bounds = array<i64: 2, 1>, scalar_prefetch = 0 : i64, scratch_operands = 0 : i64, tpu.core_type = #tpu.core_type<tc>, window_params = [{transform_indices = @transform_0, window_bounds = array<i64: 1, 8, 17>}, {transform_indices = @transform_1, window_bounds = array<i64: 1, 1, 17>}]} {
    %c0 = arith.constant 0 : index
    %c0_0 = arith.constant 0 : index
    %c0_1 = arith.constant 0 : index
    %0 = vector.load %arg2[%c0, %c0_0, %c0_1] : memref<1x8x17xf32, #tpu.memory_space<vmem>>, vector<1x8x17xf32>
    %1 = vector.shape_cast %0 : vector<1x8x17xf32> to vector<8x17xf32>
    %c0_i32 = arith.constant 0 : i32
    %2 = arith.cmpi eq, %arg1, %c0_i32 : i32
    %3 = arith.extui %2 : i1 to i32
    %c0_i32_2 = arith.constant 0 : i32
    %4 = arith.cmpi ne, %3, %c0_i32_2 : i32
    scf.if %4 {
      %cst_9 = arith.constant 0.000000e+00 : f32
      %13 = vector.broadcast %cst_9 : f32 to vector<1x17xf32>
      %c0_10 = arith.constant 0 : index
      %c0_11 = arith.constant 0 : index
      %c0_12 = arith.constant 0 : index
      %14 = vector.load %arg3[%c0_10, %c0_11, %c0_12] : memref<1x1x17xf32, #tpu.memory_space<vmem>>, vector<1x1x17xf32>
      %15 = vector.shape_cast %14 : vector<1x1x17xf32> to vector<1x17xf32>
      %16 = vector.shape_cast %13 : vector<1x17xf32> to vector<1x1x17xf32>
      tpu.vector_store %arg3[%c0_10, %c0_11, %c0_12], %16 {strides = array<i32>} : memref<1x1x17xf32, #tpu.memory_space<vmem>>, vector<1x1x17xf32>,
    } else {
    }
    %c0_3 = arith.constant 0 : index
    %c0_4 = arith.constant 0 : index
    %c0_5 = arith.constant 0 : index
    %5 = vector.load %arg3[%c0_3, %c0_4, %c0_5] : memref<1x1x17xf32, #tpu.memory_space<vmem>>, vector<1x1x17xf32>
    %6 = vector.shape_cast %5 : vector<1x1x17xf32> to vector<1x17xf32>
    %cst = arith.constant dense<0.000000e+00> : vector<17xf32>
    %7 = vector.multi_reduction <add>, %1, %cst [0] : vector<8x17xf32> to vector<17xf32>
    %8 = vector.shape_cast %7 : vector<17xf32> to vector<1x17xf32>
    %9 = arith.addf %6, %8 : vector<1x17xf32>
    %c0_6 = arith.constant 0 : index
    %c0_7 = arith.constant 0 : index
    %c0_8 = arith.constant 0 : index
    %10 = vector.load %arg3[%c0_6, %c0_7, %c0_8] : memref<1x1x17xf32, #tpu.memory_space<vmem>>, vector<1x1x17xf32>
    %11 = vector.shape_cast %10 : vector<1x1x17xf32> to vector<1x17xf32>
    %12 = vector.shape_cast %9 : vector<1x17xf32> to vector<1x1x17xf32>
    tpu.vector_store %arg3[%c0_6, %c0_7, %c0_8], %12 {strides = array<i32>} : memref<1x1x17xf32, #tpu.memory_space<vmem>>, vector<1x1x17xf32>,
    return
  }
  func.func @transform_0(%arg0: i32, %arg1: i32) -> (i32, i32, i32) {
    %c0_i32 = arith.constant 0 : i32
    %c0_i32_0 = arith.constant 0 : i32
    return %arg0, %arg1, %c0_i32 : i32, i32, i32
  }
  func.func @transform_1(%arg0: i32, %arg1: i32) -> (i32, i32, i32) {
    %c0_i32 = arith.constant 0 : i32
    %c0_i32_0 = arith.constant 0 : i32
    %c0_i32_1 = arith.constant 0 : i32
    return %arg0, %c0_i32, %c0_i32_0 : i32, i32, i32
  }
}

</mosaic_0001>

<bundles_post_ra>
// kernel: tpu_custom_call.1
= control target key start
LH: loop header
LB: loop body
LE: loop exit
PB: predicated region body
PF: predicated region fallthrough
CT: control target
= control target key end

     0   :  { %6 = vsyncpa [#allocation3], 0  ;;  %s587_s0 = inlined_call_operand.hbm [shape: f32[2,8,17], index: 0, kind: input, shape index: {}]   ;;  %s588_s1 = inlined_call_operand.hbm [shape: f32[2,1,17], index: 1, kind: output, shape index: {}]  }
   0x1   :  { %8 = vsyncpa [#allocation3 + $0x1], 0 }
   0x2   :  { %9 = vsyncpa [#allocation4], 0 }
   0x3   :  { %11 = vsyncpa [#allocation4 + $0x1], 0  ;;  %s450_s6 = smov 0   ;;  %s452_s7 = smov 0  }
   0x4   :  { %s454_s8 = smov 0   ;;  %s456_s9 = smov 0  }
   0x5   :  { %s458_s10 = smov 0   ;;  %s460_s11 = smov 0  }
   0x6 LB: > { %s253_s12 = sadd.s32 4294967295, %s435_s11   ;;  %s254_s13 = sadd.s32 4294967294, %s435_s11   ;;  %s435_s11 = sphi %s460_s11, %s17_s11   ;;  %s431_s10 = sphi %s458_s10, %s600_s10   ;;  %s427_s9 = sphi %s456_s9, %s599_s9   ;;  %s423_s8 = sphi %s454_s8, %s598_s8   ;;  %s419_s7 = sphi %s452_s7, %s597_s7   ;;  %s415_s6 = sphi %s450_s6, %s596_s6  }
   0x7   : > { %s29_s14 = sadd.s32 1, %s431_s10  ;;  %s38_s15 = sadd.s32 1, %s423_s8 }
   0x8   : > { %p31_p0 = scmp.ge.s32.totalorder %s29_s14, 2  ;;  %p45_p1 = scmp.ne.s32.totalorder %s423_s8, %s419_s7 }
   0x9   : > { %p46_p2 = scmp.eq.s32.totalorder %s435_s11, 0  ;;  %p51_p3 = scmp.ne.s32.totalorder %s419_s7, %s415_s6 }
   0xa   : > { %s602_s14 = smov (%p31_p0, %s29_s14), 0  ;;  %p52_p5 = scmp.eq.s32.totalorder %s253_s12, 0 }
   0xb   : > { %p491_p4 = por %p46_p2, %p45_p1  ;;  %s33_s17 = ssub.s32 %s431_s10, %s602_s14 }
   0xc   : > { %p75_p6 = scmp.eq.s32.totalorder %s253_s12, 1  ;;  %p36_p7 = scmp.eq.s32.totalorder %s33_s17, 0 }
   0xd   : > { %p497_p8 = por %p52_p5, %p51_p3  ;;  %p81_p10 = scmp.eq.s32.totalorder %s254_s13, 1 }
   0xe   : > { %p501_p9 = por %p75_p6, %p45_p1  ;;  %p276_p13 = scmp.lt.s32.totalorder %s435_s11, 2 }
   0xf   : > { %s506_s20 = scalar_select %p36_p7, %s423_s8, %s38_s15  }
  0x10   : > { %p508_p11 = por %p81_p10, %p51_p3  ;;  %s101_s22 = sand.u32 1, %s423_s8  }
  0x11   : > { %s257_s23 = sshll.u32 %s101_s22, 3  ;;  %s258_s24 = sshll.u32 %s431_s10, 7 }
  0x12   : > { %s592_s21 = scalar_select %p508_p11, 1, 0 }
  0x13   : > { %s111_s27 = scalar_lea.hbm %s587_s0, %s258_s24  ;;  %s105_s28 = scalar_lea.vmem [#allocation2], %s257_s23 }
  0x14   : > { %s113_s29 = sshll.u32 %s105_s28, 4  ;;  %p521_p0 = pnand %p276_p13, %p491_p4  ;;  %s114_s29 = int_to_ptr.vmem [resolvable:$true] %s113_s29 }
  0x15   : > { %p259_p1 = scmp.ge.s32.totalorder %s435_s11, 1  ;;  %p118_p2 = scmp.lt.s32.totalorder %s435_s11, 3 }
  0x16   : > { %s102_s2 = scalar_lea.sflag [#allocation3], %s101_s22  ;;  %p329_p3 = pneg %p521_p0 }
  0x17   : > { %s340_s3 = scalar_lea.vmem %s114_s29, 128  ;;  %s437_s4 = smov [#allocation2]  }
  0x18   : > { %p341_p5 = scmp.ne.s32.totalorder %s114_s29, %s340_s3  ;;  %s345_s5 = sshll.u32 %s437_s4, 4  ;;  %s346_s5 = int_to_ptr.vmem [resolvable:$false] %s345_s5 }
  0x19   : > { %s347_s12 = scalar_lea.vmem %s346_s5, 256  ;;  %p348_p10 = scmp.lt.s32.totalorder %s114_s29, %s346_s5 }
  0x1a   : > { %p343_p6 = pnand %p341_p5, %p329_p3  ;;  %p349_p12 = scmp.lt.s32.totalorder %s347_s12, %s340_s3 }
  0x1c   : > { %p344_p7 = pneg %p343_p6  ;;  %p350_p4 = por %p349_p12, %p348_p10 }
  0x1e   : > { %p351_p13 = pnand %p350_p4, %p344_p7 }
  0x20   : > { %354 = shalt.err (!%p351_p13)
}
  0x21   : > { %271 = dma.hbm_to_vmem [thread:$0]  (!%p521_p0), %s111_s27, 128, %s114_s29, %s102_s2  }
  0x22   : > { %p119_p11 = pnand %p259_p1, %p118_p2 }
  0x23   : > { %s536_s13 = sand.u32 (!%p119_p11), 1, %s419_s7  }
  0x24   : > { %122 = sbr.rel (%p119_p11) target bundleno = 71 (0x47), region = 24  ;;  %s260_s15 = sshll.u32 (!%p119_p11), %s536_s13, 3 }
  0x25   : > { %s125_s16 = scalar_lea.sflag (!%p119_p11), [#allocation3], %s536_s13  ;;  %s128_s17 = scalar_lea.vmem (!%p119_p11), [#allocation2], %s260_s15 }
  0x29   : > { %406 = dma.done.wait (%p497_p8), %s125_s16, 128  }
  0x2a   : > { %408 = vsyncadd (%p497_p8), %s125_s16, 4294967168  ;;  %vm151_vm0 = vcmask 131072   ;;  %s145_s22 = scalar_lea.vmem [#allocation5], %s536_s13  ;;  %v438_v0 = vmov 0.0   ;;  %vm154_vm1 = vcmask 138240   ;;  %v146_v1 = vld [vmem:[%s128_s17] sm:$0xff] }
  0x2b   : > { %152 = vst.msk [vmem:[%s145_s22] sm:$0x1] %vm151_vm0, %v438_v0  ;;  %v155_v2 = vsel %vm154_vm1, %v146_v1, 0.0  ;;  %s261_s18 = sshll.u32 %s427_s9, 4  ;;  %s178_s23 = sshll.u32 %s145_s22, 4  ;;  %s179_s23 = int_to_ptr.vmem [resolvable:$true] %s178_s23 }
  0x2c   : > { %v156_v3 = vrot.slane %v155_v2, 4  ;;  %s176_s26 = scalar_lea.hbm %s588_s1, %s261_s18  ;;  %s166_s27 = scalar_lea.sflag [#allocation4], %s536_s13 }
  0x2d   : > { %s355_s28 = scalar_lea.vmem %s179_s23, 16  ;;  %s439_s29 = smov [#allocation5]  }
  0x2e   : > { %v157_v4 = vadd.f32 %v156_v3, %v155_v2  ;;  %p356_p8 = scmp.ne.s32.totalorder %s179_s23, %s355_s28  ;;  %s359_s30 = sshll.u32 %s439_s29, 4  ;;  %s360_s30 = int_to_ptr.vmem [resolvable:$false] %s359_s30 }
  0x2f   : > { %s361_s9 = scalar_lea.vmem %s360_s30, 32  ;;  %p362_p0 = scmp.lt.s32.totalorder %s179_s23, %s360_s30 }
  0x30   : > { %v158_v5 = vrot.slane %v157_v4, 2  ;;  %p357_p11 = pnand %p356_p8, %p501_p9  ;;  %p363_p1 = scmp.lt.s32.totalorder %s361_s9, %s355_s28 }
  0x32   : > { %v159_v6 = vadd.f32 %v158_v5, %v157_v4  ;;  %v153_v8 = vld [vmem:[%s145_s22] sm:$0x1]  ;;  %p358_p12 = pneg %p357_p11  ;;  %p364_p2 = por %p363_p1, %p362_p0 }
  0x34   : > { %v160_v7 = vrot.slane %v159_v6, 1  ;;  %p365_p3 = pnand %p364_p2, %p358_p12 }
  0x36   : > { %v161_v9 = vadd.f32 %v160_v7, %v159_v6 }
  0x38   : > { %v162_v10 = vadd.f32 %v161_v9, %v153_v8 }
  0x3a   : > { %164 = vst.msk [vmem:[%s145_s22] sm:$0x1] %vm151_vm0, %v162_v10 }
  0x3b   : > { %368 = shalt.err (!%p365_p3)
}
  0x3c   : > { %s369_s2 = scalar_lea.hbm %s176_s26, 16  ;;  %s373_s5 = scalar_lea.hbm %s588_s1, 32 }
  0x3d   : > { %p370_p5 = scmp.ne.s32.totalorder %s176_s26, %s369_s2  ;;  %p374_p10 = scmp.lt.s32.totalorder %s176_s26, %s588_s1 }
  0x3e   : > { %p375_p4 = scmp.lt.s32.totalorder %s373_s5, %s369_s2 }
  0x3f   : > { %p371_p6 = pnand %p370_p5, %p501_p9 }
  0x40   : > { %p376_p13 = por %p375_p4, %p374_p10 }
  0x41   : > { %p372_p7 = pneg %p371_p6 }
  0x43   : > { %p377_p8 = pnand %p376_p13, %p372_p7 }
  0x45   : > { %380 = shalt.err (!%p377_p8)
}
  0x46   : > { %266 = dma.vmem_to_hbm [thread:$0]  (%p501_p9), %s179_s23, 16, %s176_s26, %s166_s27  }
  0x47 PF: > { %s190_s15 = sand.u32 1, %s415_s6   ;;  %p594_p11 = scmp.ne.s32.totalorder %s592_s21, 0 }
  0x48   : > { %p595_p12 = scmp.ge.s32.totalorder %s435_s11, 2  ;;  %s191_s16 = scalar_lea.sflag [#allocation4], %s190_s15 }
  0x4a   : > { %p273_p0 = pnand %p595_p12, %p594_p11 }
  0x4c   : > { %p274_p1 = pneg %p273_p0 }
  0x4e   : > { %410 = dma.done.wait (%p274_p1), %s191_s16, 16  }
  0x4f   : > { %412 = vsyncadd (%p274_p1), %s191_s16, 4294967280  ;;  %s17_s11 = sadd.s32 1, %s435_s11   ;;  %s596_s6 = smov %s419_s7 }
  0x50   : > { %p14_p2 = scmp.ge.s32.totalorder %s17_s11, 4   ;;  %s597_s7 = smov %s423_s8 }
  0x51   : > { %s598_s8 = smov %s506_s20  ;;  %s599_s9 = smov %s431_s10 }
  0x52   : > { %s600_s10 = smov %s602_s14  ;;  %16 = sbr.rel (!%p14_p2) target bundleno = 6 (0x6), region = 73 }
  0x57   :  { %195 = vsyncpa [#allocation3], 1 }
  0x58   :  { %197 = vsyncpa [#allocation3 + $0x1], 1 }
  0x59   :  { %198 = vsyncpa [#allocation4], 1 }
  0x5a   :  { %200 = vsyncpa [#allocation4 + $0x1], 1 }

</bundles_post_ra>
